<compile_context>
chip_gen: v6e
topology: v6e:2x2x1
jax: 0.10.0
libtpu: 0.0.40
codegen_flags: <defaults>
</compile_context>

<pallas_src>
import jax
import jax.numpy as jnp
from jax.experimental import pallas as pl
from jax.experimental.pallas import tpu as pltpu


def _round_up(x, m):
    return ((x + m - 1) // m) * m


def _tpu_params():
    """Per-generation (tensorcores_per_chip, vmem_limit_bytes); conservative defaults."""
    kind = ""
    try:
        kind = jax.devices()[0].device_kind.lower()
    except Exception:
        pass
    if "v7" in kind:
        # v7x: 2 TensorCores, 64 MiB physical VMEM -> keep the scoped limit modest.
        return 2, 32 * 1024 * 1024
    # v5e / v6e: single TensorCore, 128 MiB physical VMEM.
    return 1, 64 * 1024 * 1024


def _per_batch_vmem_bytes(Lb, Lp, lp_pad, D, in_itemsize):
    """Upper-bound VMEM footprint contributed by one batch element (blocks + temps)."""
    # Double-buffered pipelined blocks (inputs in native dtype, output f32).
    io = 2 * (Lb * D + Lp * D) * in_itemsize + 2 * Lb * lp_pad * 4
    # In-kernel f32 temporaries: body_f32, pun_f32, lhs, cross/result, zero background.
    tmp = (2 * Lb * D + Lp * D) * 4 + 3 * Lb * lp_pad * 4
    return io + tmp


def _choose_batch_tile(B, per_batch_bytes, vmem_budget, num_tc):
    """Largest divisor of B whose footprint fits the VMEM budget.

    On 2-TC chips (v7x) prefer an even number of >=2 grid steps so both
    TensorCores get equal work under dimension_semantics=("parallel",); on
    single-TC chips (v5e/v6e) the grid is a sequential loop, so one big step
    minimizes per-step pipeline overhead.
    """
    divisors = [bt for bt in range(1, B + 1) if B % bt == 0]
    fitting = [bt for bt in divisors if bt * per_batch_bytes <= vmem_budget] or [1]
    if num_tc >= 2:
        even = [bt for bt in fitting if (B // bt) >= 2 and (B // bt) % 2 == 0]
        if even:
            return max(even)
        multi = [bt for bt in fitting if (B // bt) >= 2]
        if multi:
            return max(multi)
    return max(fitting)


def alignment_matrix(body, pun, w_u, *, batch_tile=None, trim=True):
    """AlignmentMatrix forward.

    body: (B, Lb, D), pun: (B, Lp, D), w_u: (3*D, 1).
    trim=True  -> (B, Lb, Lp) float32, exact module semantics.
    trim=False -> (B, Lb, lp_pad) float32 with lp_pad = round_up(Lp, 128); columns
                  >= Lp are zero and must be masked by downstream max/softmax
                  pooling. Skips the extra HBM->HBM slice kernel.
    """
    B, Lb, D = body.shape
    Bp, Lp, Dp = pun.shape
    assert Bp == B and Dp == D
    assert w_u.shape == (3 * D, 1)
    w_rows = w_u.reshape(3, D).astype(jnp.float32)  # [w1; w2; w3]

    # Output padded to a lane-dense width (multiple of 128): unmasked writeback DMA.
    # pun itself is never padded in HBM.
    lp_pad = max(128, _round_up(Lp, 128))

    num_tc, vmem_limit = _tpu_params()
    vmem_budget = (24 * 1024 * 1024) if num_tc >= 2 else (vmem_limit // 2)
    itemsize = jnp.dtype(body.dtype).itemsize
    per_batch = _per_batch_vmem_bytes(Lb, Lp, lp_pad, D, itemsize)
    bt = (batch_tile if batch_tile is not None
          else _choose_batch_tile(B, per_batch, vmem_budget, num_tc))
    assert B % bt == 0
    num_steps = B // bt

    def kernel(body_ref, pun_ref, w_ref, out_ref):
        # body_ref: (bt, Lb, D), pun_ref: (bt, Lp, D) unpadded, w_ref: (3, D),
        # out_ref: (bt, Lb, lp_pad).
        body = body_ref[...]
        pun = pun_ref[...]
        w = w_ref[...]
        w1 = w[0:1, :]
        w2 = w[1:2, :]
        w3 = w[2:3, :]

        body_f32 = body.astype(jnp.float32)
        pun_f32 = pun.astype(jnp.float32)

        # Bias terms (small, kept in f32). pw is computed over the real Lp rows only.
        bw = jnp.sum(body_f32 * w1, axis=-1, keepdims=True)     # (bt, Lb, 1)
        pw = jnp.sum(pun_f32 * w2, axis=-1)[:, None, :]         # (bt, 1, Lp)

        # Trilinear term on the MXU. Fold w3 into the LHS in f32, downcast once so
        # bf16 inputs feed the MXU natively; accumulate in f32.
        lhs = (body_f32 * w3).astype(body.dtype)                # (bt, Lb, D)
        cross = jax.lax.dot_general(
            lhs, pun,
            dimension_numbers=(((2,), (2,)), ((0,), (0,))),
            preferred_element_type=jnp.float32)                 # (bt, Lb, Lp)

        result = (cross + bw + pw).astype(out_ref.dtype)        # (bt, Lb, Lp)
        if lp_pad == Lp:
            out_ref[...] = result
        else:
            # Lane-dense background store (padded columns stay zero), then one
            # narrow masked store of the real columns.
            out_ref[...] = jnp.zeros(out_ref.shape, out_ref.dtype)
            out_ref[:, :, :Lp] = result

    out = pl.pallas_call(
        kernel,
        out_shape=jax.ShapeDtypeStruct((B, Lb, lp_pad), jnp.float32),
        grid_spec=pltpu.PrefetchScalarGridSpec(
            num_scalar_prefetch=0,
            grid=(num_steps,),
            in_specs=[
                # Inputs DMAed in their native dtype; pun unpadded.
                pl.BlockSpec((bt, Lb, D), lambda s: (s, 0, 0)),
                pl.BlockSpec((bt, Lp, D), lambda s: (s, 0, 0)),
                # Constant block index -> weight slab stays resident in VMEM.
                pl.BlockSpec((3, D), lambda s: (0, 0)),
            ],
            out_specs=pl.BlockSpec((bt, Lb, lp_pad), lambda s: (s, 0, 0)),
        ),
        compiler_params=pltpu.CompilerParams(
            dimension_semantics=("parallel",),
            vmem_limit_bytes=vmem_limit,
        ),
    )(body, pun, w_rows)

    if trim:
        # Exact module semantics. Production callers that mask columns >= Lp in the
        # downstream pooling should pass trim=False and skip this HBM->HBM slice.
        return out[:, :, :Lp]
    return out


def alignment_matrix_ref(body, pun, w_u):
    """Pure-JAX reference matching the PyTorch double loop."""
    D = body.shape[-1]
    w1 = w_u[:D, 0]
    w2 = w_u[D:2 * D, 0]
    w3 = w_u[2 * D:, 0]
    bw = jnp.einsum("bid,d->bi", body, w1)
    pw = jnp.einsum("bjd,d->bj", pun, w2)
    cross = jnp.einsum("bid,d,bjd->bij", body, w3, pun)
    return cross + bw[:, :, None] + pw[:, None, :]


if __name__ == "__main__":
    hidden_dim = 64            # fgian_config['hidden_dim']
    D = 2 * hidden_dim         # 128: bi-LSTM output width (3*D = 6*hidden_dim)
    B, Lb, Lp = 8, 16, 9
    lp_pad = max(128, _round_up(Lp, 128))

    key = jax.random.PRNGKey(0)
    k_body, k_pun, k_w = jax.random.split(key, 3)
    body = jax.random.normal(k_body, (B, Lb, D), dtype=jnp.float32)
    pun = jax.random.normal(k_pun, (B, Lp, D), dtype=jnp.float32)
    # Deterministic stand-in for nn.Parameter(torch.Tensor(6*hidden_dim, 1)).
    w_u = jax.random.normal(k_w, (3 * D, 1), dtype=jnp.float32) * 0.02

    ref = alignment_matrix_ref(body, pun, w_u)

    # Production path: padded lane-dense output (downstream pooling masks cols >= Lp).
    out_padded = alignment_matrix(body, pun, w_u, trim=False)
    out_padded = jax.block_until_ready(out_padded)
    assert out_padded.shape == (B, Lb, lp_pad)
    assert jnp.allclose(out_padded[:, :, :Lp], ref, atol=1e-4, rtol=1e-4)
    assert jnp.allclose(out_padded[:, :, Lp:], 0.0)

    # Exact module-shaped output.
    out = alignment_matrix(body, pun, w_u)
    out = jax.block_until_ready(out)
    assert out.shape == (B, Lb, Lp)
    assert jnp.allclose(out, ref, atol=1e-4, rtol=1e-4)

    print("KERNEL_OK")
</pallas_src>

<mosaic_0001>
module attributes {stable_mosaic.version = 11 : i64} {
  func.func @kernel(%arg0: i32, %arg1: memref<8x16x128xf32, #tpu.memory_space<vmem>>, %arg2: memref<8x9x128xf32, #tpu.memory_space<vmem>>, %arg3: memref<3x128xf32, #tpu.memory_space<vmem>>, %arg4: memref<8x16x128xf32, #tpu.memory_space<vmem>>) attributes {dimension_semantics = [#tpu.dimension_semantics<parallel>], iteration_bounds = array<i64: 1>, scalar_prefetch = 0 : i64, scratch_operands = 0 : i64, tpu.core_type = #tpu.core_type<tc>, window_params = [{transform_indices = @transform_0, window_bounds = array<i64: 8, 16, 128>}, {transform_indices = @transform_1, window_bounds = array<i64: 8, 9, 128>}, {pipeline_mode = #tpu.pipeline_mode<synchronous>, transform_indices = @transform_2, window_bounds = array<i64: 3, 128>}, {transform_indices = @transform_3, window_bounds = array<i64: 8, 16, 128>}]} {
    %c0 = arith.constant 0 : index
    %c0_0 = arith.constant 0 : index
    %c0_1 = arith.constant 0 : index
    %0 = vector.load %arg1[%c0, %c0_0, %c0_1] : memref<8x16x128xf32, #tpu.memory_space<vmem>>, vector<8x16x128xf32>
    %c0_2 = arith.constant 0 : index
    %c0_3 = arith.constant 0 : index
    %c0_4 = arith.constant 0 : index
    %1 = vector.load %arg2[%c0_2, %c0_3, %c0_4] : memref<8x9x128xf32, #tpu.memory_space<vmem>>, vector<8x9x128xf32>
    %c0_5 = arith.constant 0 : index
    %c0_6 = arith.constant 0 : index
    %2 = vector.load %arg3[%c0_5, %c0_6] : memref<3x128xf32, #tpu.memory_space<vmem>>, vector<3x128xf32>
    %3 = vector.extract_strided_slice %2 {offsets = [0, 0], sizes = [1, 128], strides = [1, 1]} : vector<3x128xf32> to vector<1x128xf32>
    %4 = vector.extract_strided_slice %2 {offsets = [1, 0], sizes = [1, 128], strides = [1, 1]} : vector<3x128xf32> to vector<1x128xf32>
    %5 = vector.extract_strided_slice %2 {offsets = [2, 0], sizes = [1, 128], strides = [1, 1]} : vector<3x128xf32> to vector<1x128xf32>
    %6 = vector.shape_cast %3 : vector<1x128xf32> to vector<1x1x128xf32>
    %7 = vector.broadcast %6 : vector<1x1x128xf32> to vector<8x16x128xf32>
    %8 = arith.mulf %0, %7 : vector<8x16x128xf32>
    %cst = arith.constant dense<0.000000e+00> : vector<8x16xf32>
    %9 = vector.multi_reduction <add>, %8, %cst [2] : vector<8x16x128xf32> to vector<8x16xf32>
    %10 = vector.shape_cast %9 : vector<8x16xf32> to vector<8x16x1xf32>
    %11 = vector.shape_cast %4 : vector<1x128xf32> to vector<1x1x128xf32>
    %12 = vector.broadcast %11 : vector<1x1x128xf32> to vector<8x9x128xf32>
    %13 = arith.mulf %1, %12 : vector<8x9x128xf32>
    %cst_7 = arith.constant dense<0.000000e+00> : vector<8x9xf32>
    %14 = vector.multi_reduction <add>, %13, %cst_7 [2] : vector<8x9x128xf32> to vector<8x9xf32>
    %15 = vector.shape_cast %14 : vector<8x9xf32> to vector<8x1x9xf32>
    %16 = vector.shape_cast %5 : vector<1x128xf32> to vector<1x1x128xf32>
    %17 = vector.broadcast %16 : vector<1x1x128xf32> to vector<8x16x128xf32>
    %18 = arith.mulf %0, %17 : vector<8x16x128xf32>
    %cst_8 = arith.constant dense<0.000000e+00> : vector<8x16x9xf32>
    %19 = tpu.matmul %18, %1, %cst_8 {dimension_numbers = #tpu.dot_dimension_numbers<[2], [2], [1], [1], [0, 0, 0, 1, 1, 1], [0], [0]>} : vector<8x16x128xf32>, vector<8x9x128xf32>, vector<8x16x9xf32> -> vector<8x16x9xf32>
    %20 = vector.broadcast %10 : vector<8x16x1xf32> to vector<8x16x9xf32>
    %21 = arith.addf %19, %20 : vector<8x16x9xf32>
    %22 = vector.broadcast %15 : vector<8x1x9xf32> to vector<8x16x9xf32>
    %23 = arith.addf %21, %22 : vector<8x16x9xf32>
    %cst_9 = arith.constant 0.000000e+00 : f32
    %24 = vector.broadcast %cst_9 : f32 to vector<8x16x128xf32>
    %c0_10 = arith.constant 0 : index
    %c0_11 = arith.constant 0 : index
    %c0_12 = arith.constant 0 : index
    %25 = vector.load %arg4[%c0_10, %c0_11, %c0_12] : memref<8x16x128xf32, #tpu.memory_space<vmem>>, vector<8x16x128xf32>
    tpu.vector_store %arg4[%c0_10, %c0_11, %c0_12], %24 {strides = array<i32>} : memref<8x16x128xf32, #tpu.memory_space<vmem>>, vector<8x16x128xf32>,
    %c0_13 = arith.constant 0 : index
    %c0_14 = arith.constant 0 : index
    %c0_15 = arith.constant 0 : index
    %26 = vector.load %arg4[%c0_13, %c0_14, %c0_15] : memref<8x16x128xf32, #tpu.memory_space<vmem>>, vector<8x16x9xf32>
    tpu.vector_store %arg4[%c0_13, %c0_14, %c0_15], %23 {strides = array<i32>} : memref<8x16x128xf32, #tpu.memory_space<vmem>>, vector<8x16x9xf32>,
    return
  }
  func.func @transform_0(%arg0: i32) -> (i32, i32, i32) {
    %c0_i32 = arith.constant 0 : i32
    %c0_i32_0 = arith.constant 0 : i32
    %c0_i32_1 = arith.constant 0 : i32
    return %arg0, %c0_i32, %c0_i32_0 : i32, i32, i32
  }
  func.func @transform_1(%arg0: i32) -> (i32, i32, i32) {
    %c0_i32 = arith.constant 0 : i32
    %c0_i32_0 = arith.constant 0 : i32
    %c0_i32_1 = arith.constant 0 : i32
    return %arg0, %c0_i32, %c0_i32_0 : i32, i32, i32
  }
  func.func @transform_2(%arg0: i32) -> (i32, i32) {
    %c0_i32 = arith.constant 0 : i32
    %c0_i32_0 = arith.constant 0 : i32
    %c0_i32_1 = arith.constant 0 : i32
    return %c0_i32, %c0_i32_0 : i32, i32
  }
  func.func @transform_3(%arg0: i32) -> (i32, i32, i32) {
    %c0_i32 = arith.constant 0 : i32
    %c0_i32_0 = arith.constant 0 : i32
    %c0_i32_1 = arith.constant 0 : i32
    return %arg0, %c0_i32, %c0_i32_0 : i32, i32, i32
  }
}

</mosaic_0001>

<bundles_post_ra>
// kernel: tpu_custom_call.1
= control target key start
LH: loop header
LB: loop body
LE: loop exit
PB: predicated region body
PF: predicated region fallthrough
CT: control target
= control target key end

     0   :  { %v48_v3 = vlaneseq  ;;  %s1468_s0 = inlined_call_operand.vmem [shape: f32[8,16,128], index: 0, kind: input, shape index: {}]   ;;  %s1469_s1 = inlined_call_operand.vmem [shape: f32[8,9,128], index: 1, kind: input, shape index: {}]   ;;  %s1470_s2 = inlined_call_operand.vmem [shape: f32[3,128], index: 2, kind: input, shape index: {}]   ;;  %s1471_s3 = inlined_call_operand.hbm [shape: f32[8,16,128], index: 3, kind: output, shape index: {}]  }
   0x1   :  { %v1141_v0 = vld [vmem:[%s1469_s1 + $0x8] sm:$0x1]  ;;  %v1146_v1 = vld [vmem:[%s1469_s1 + $0x18] sm:$0x1]  ;;  %v31_v2 = vld [vmem:[%s1469_s1] sm:$0xff] }
   0x2   :  { %1032 = vmatprep.subr.mxu0 %v1141_v0  ;;  %1039 = vmatprep.subr.mxu1 %v1146_v1  ;;  %v33_v4 = vld [vmem:[%s1469_s1 + $0x10] sm:$0xff]  ;;  %v1158_v5 = vshrl.u32 %v48_v3, 7  ;;  %v1163_v6 = vld [vmem:[%s1468_s0] sm:$0xff]  ;;  %v1170_v8 = vand.u32 127, %v48_v3  ;;  %v1176_v10 = vld [vmem:[%s1469_s1 + $0x28] sm:$0x1] }
   0x3   :  { %1033 = vmatpush3.xpose.msra.mxu0 %v1141_v0  ;;  %1040 = vmatpush3.xpose.msra.mxu1 %v1146_v1  ;;  %v1168_v7 = vld [vmem:[%s1470_s2] sm:$0x7]  ;;  %v1181_v11 = vld [vmem:[%s1469_s1 + $0x38] sm:$0x1]  ;;  %v1187_v13 = vld [vmem:[%s1468_s0 + $0x10] sm:$0xff] }
   0x4   :  { %1034 = vmatprep.subr.mxu0 %v31_v2  ;;  %1041 = vmatprep.subr.mxu1 %v33_v4  ;;  %v163_v9 = vsub.s32 2, %v1158_v5  ;;  %v102_v12 = vsub.s32 1, %v1158_v5  ;;  %v1192_v14 = vld [vmem:[%s1468_s0 + $0x8] sm:$0xff]  ;;  %v1197_v15 = vld [vmem:[%s1468_s0 + $0x18] sm:$0xff]  ;;  %v1201_v16 = vsub.s32 %v1170_v8, %v1158_v5  ;;  %v1211_v18 = vld [vmem:[%s1468_s0 + $0x20] sm:$0xff] }
   0x5   :  { %v1216_v19 = vld [vmem:[%s1468_s0 + $0x30] sm:$0xff]  ;;  %v35_v25 = vld [vmem:[%s1469_s1 + $0x20] sm:$0xff] }
   0x6   :  { %v1204_v17 = vrot.slane %v1168_v7, %v163_v9  ;;  %v1219_v20 = vrot.slane %v1168_v7, %v102_v12  ;;  %v1235_v26 = vld [vmem:[%s1469_s1 + $0x30] sm:$0xff] }
   0x7   :  { %1035 = vmatpush3.xpose.msra.mxu0 %v31_v2  ;;  %1042 = vmatpush3.xpose.msra.mxu1 %v33_v4 }
   0x8   :  { %1046 = vmatprep.subr.mxu0 %v1176_v10  ;;  %1053 = vmatprep.subr.mxu1 %v1181_v11  ;;  %v165_v21 = vmul.f32 %v1204_v17, %v1163_v6  ;;  %v167_v22 = vmul.f32 %v1204_v17, %v1187_v13  ;;  %v166_v23 = vmul.f32 %v1204_v17, %v1192_v14 }
   0x9   :  { %v168_v24 = vmul.f32 %v1204_v17, %v1197_v15  ;;  %v169_v27 = vmul.f32 %v1204_v17, %v1211_v18  ;;  %v171_v28 = vmul.f32 %v1204_v17, %v1216_v19  ;;  %v104_v29 = vmul.f32 %v1219_v20, %v31_v2 }
   0xa   :  { %1036 = vmatprep.mubr.f32.mxu0 %v165_v21  ;;  %1043 = vmatprep.mubr.f32.mxu1 %v167_v22  ;;  %v106_v30 = vmul.f32 %v1219_v20, %v33_v4 }
   0xb   :  { %1037 = vmatmul.mubr.f32.vlgmr.msra.gmra.mxu0 %v166_v23  ;;  %1044 = vmatmul.mubr.f32.vlgmr.msra.gmra.mxu1 %v168_v24 }
   0xc   :  { %8 = vsyncpa [#allocation3], 0  ;;  %1047 = vmatpush3.xpose.msra.mxu0 %v1176_v10  ;;  %1054 = vmatpush3.xpose.msra.mxu1 %v1181_v11  ;;  %v1248_v31 = vld [vmem:[%s1468_s0 + $0x28] sm:$0xff]  ;;  %v1253_v32 = vld [vmem:[%s1468_s0 + $0x38] sm:$0xff]  ;;  %v107_v39 = vmul.f32 %v1219_v20, %v1146_v1  ;;  %vm122_vm0 = vcmask 1040384   ;;  %v108_v44 = vmul.f32 %v1219_v20, %v35_v25  ;;  %v105_v52 = vmul.f32 %v1219_v20, %v1141_v0 }
   0xd   :  { %1048 = vmatprep.subr.mxu0 %v35_v25  ;;  %1055 = vmatprep.subr.mxu1 %v1235_v26  ;;  %v1259_v33 = vld [vmem:[%s1469_s1 + $0x48] sm:$0x1]  ;;  %v1264_v34 = vld [vmem:[%s1469_s1 + $0x58] sm:$0x1]  ;;  %v170_v35 = vmul.f32 %v1204_v17, %v1248_v31  ;;  %v172_v36 = vmul.f32 %v1204_v17, %v1253_v32  ;;  %v1273_v37 = vld [vmem:[%s1468_s0 + $0x40] sm:$0xff]  ;;  %v109_v55 = vmul.f32 %v1219_v20, %v1176_v10  ;;  %v803_v10 = vadd.s32 4294967288, %v1170_v8 }
   0xe   :  { %1050 = vmatprep.mubr.f32.mxu0 %v169_v27  ;;  %1057 = vmatprep.mubr.f32.mxu1 %v171_v28  ;;  %v1278_v38 = vld [vmem:[%s1468_s0 + $0x50] sm:$0xff]  ;;  %v39_v40 = vld [vmem:[%s1469_s1 + $0x40] sm:$0xff]  ;;  %v173_v42 = vmul.f32 %v1204_v17, %v1273_v37  ;;  %v1303_v45 = vld [vmem:[%s1468_s0 + $0x48] sm:$0xff]  ;;  %v128_v47 = vsel %vm122_vm0, %v107_v39, 0.0  ;;  %v123_v59 = vsel %vm122_vm0, %v105_v52, 0.0  ;;  %v111_v0 = vmul.f32 %v1219_v20, %v1181_v11 }
   0xf   :  { %120 = vadd.xlane.f32.xlu0 %v104_v29  ;;  %126 = vadd.xlane.f32.xlu1 %v106_v30  ;;  %v1291_v41 = vld [vmem:[%s1469_s1 + $0x50] sm:$0xff]  ;;  %v175_v43 = vmul.f32 %v1204_v17, %v1278_v38  ;;  %v1308_v46 = vld [vmem:[%s1468_s0 + $0x58] sm:$0xff]  ;;  %v44_v48 = vld [vmem:[%s1469_s1 + $0x68] sm:$0x1]  ;;  %v174_v50 = vmul.f32 %v1204_v17, %v1303_v45  ;;  %v133_v63 = vsel %vm122_vm0, %v109_v55, 0.0  ;;  %v110_v1 = vmul.f32 %v1219_v20, %v1235_v26 }
  0x10   :  { %1049 = vmatpush3.xpose.msra.mxu0 %v35_v25  ;;  %1056 = vmatpush3.xpose.msra.mxu1 %v1235_v26  ;;  %v46_v49 = vld [vmem:[%s1469_s1 + $0x78] sm:$0x1]  ;;  %v176_v51 = vmul.f32 %v1204_v17, %v1308_v46  ;;  %v1327_v53 = vld [vmem:[%s1468_s0 + $0x60] sm:$0xff]  ;;  %v1333_v54 = vld [vmem:[%s1468_s0 + $0x70] sm:$0xff]  ;;  %v138_v4 = vsel %vm122_vm0, %v111_v0, 0.0  ;;  %v113_v9 = vmul.f32 %v1219_v20, %v1259_v33  ;;  %v112_v11 = vmul.f32 %v1219_v20, %v39_v40 }
  0x11   :  { %1060 = vmatprep.subr.mxu0 %v1259_v33  ;;  %1067 = vmatprep.subr.mxu1 %v1264_v34  ;;  %v43_v56 = vld [vmem:[%s1469_s1 + $0x60] sm:$0xff]  ;;  %v45_v57 = vld [vmem:[%s1469_s1 + $0x70] sm:$0xff]  ;;  %v177_v58 = vmul.f32 %v1204_v17, %v1327_v53  ;;  %v179_v60 = vmul.f32 %v1204_v17, %v1333_v54  ;;  %v1351_v61 = vld [vmem:[%s1468_s0 + $0x68] sm:$0xff]  ;;  %v1373_v12 = vsub.s32 %v803_v10, %v1158_v5  ;;  %v50_v25 = vsub.s32 0, %v1158_v5 }
  0x12   :  { %v1356_v62 = vld [vmem:[%s1468_s0 + $0x78] sm:$0xff]  ;;  %v178_v2 = vmul.f32 %v1204_v17, %v1351_v61  ;;  %v115_v21 = vmul.f32 %v1219_v20, %v1264_v34  ;;  %v114_v22 = vmul.f32 %v1219_v20, %v1291_v41  ;;  %v117_v23 = vmul.f32 %v1219_v20, %v44_v48  ;;  %s1115_s0 = smov [#allocation2]  }
  0x13   :  { %1051 = vmatmul.mubr.f32.vlgmr.msra.gmra.mxu0 %v170_v35  ;;  %1058 = vmatmul.mubr.f32.vlgmr.msra.gmra.mxu1 %v172_v36  ;;  %v180_v3 = vmul.f32 %v1204_v17, %v1356_v62  ;;  %v143_v17 = vsel %vm122_vm0, %v113_v9, 0.0  ;;  %v116_v24 = vmul.f32 %v1219_v20, %v43_v56  ;;  %v119_v27 = vmul.f32 %v1219_v20, %v46_v49  ;;  %s989_s1 = sshll.u32 %s1115_s0, 4  ;;  %s990_s1 = int_to_ptr.vmem [resolvable:$true] %s989_s1 }
  0x14   :  { %1061 = vmatpush3.xpose.msra.mxu0 %v1259_v33  ;;  %1068 = vmatpush3.xpose.msra.mxu1 %v1264_v34  ;;  %v148_v8 = vsel %vm122_vm0, %v115_v21, 0.0  ;;  %v153_v26 = vsel %vm122_vm0, %v117_v23, 0.0  ;;  %v118_v28 = vmul.f32 %v1219_v20, %v45_v57  ;;  %v51_v29 = vrot.slane %v1168_v7, %v50_v25  ;;  %s1092_s22 = scalar_lea.vmem %s990_s1, 2048  ;;  %p1097_p1 = scmp.lt.s32.totalorder %s990_s1, %s990_s1 }
  0x15   :  { %1062 = vmatprep.subr.mxu0 %v39_v40  ;;  %1069 = vmatprep.subr.mxu1 %v1291_v41  ;;  %v158_v30 = vsel %vm122_vm0, %v119_v27, 0.0  ;;  %v1114_v39 = vmov 0.0   ;;  %vm808_vm1 = vcmask 130112   ;;  %vm967_vm2 = vcmask 72704   ;;  %p1093_p0 = scmp.ne.s32.totalorder %s990_s1, %s1092_s22  ;;  %p1098_p2 = scmp.lt.s32.totalorder %s1092_s22, %s1092_s22 }
  0x16   :  { %1064 = vmatprep.mubr.f32.mxu0 %v173_v42  ;;  %1071 = vmatprep.mubr.f32.mxu1 %v175_v43  ;;  %v52_v33 = vmul.f32 %v51_v29, %v1163_v6  ;;  %v53_v34 = vmul.f32 %v51_v29, %v1192_v14  ;;  %v54_v5 = vmul.f32 %v51_v29, %v1187_v13 }
  0x17   :  { %131 = vadd.xlane.f32.xlu0 %v108_v44  ;;  %129 = vadd.xlane.f32.xlu1 %v128_v47  ;;  %v55_v35 = vmul.f32 %v51_v29, %v1197_v15  ;;  %v56_v20 = vmul.f32 %v51_v29, %v1211_v18  ;;  %v57_v7 = vmul.f32 %v51_v29, %v1248_v31  ;;  %p1099_p3 = por %p1098_p2, %p1097_p1 }
  0x18   :  { %1063 = vmatpush3.xpose.msra.mxu0 %v39_v40  ;;  %1070 = vmatpush3.xpose.msra.mxu1 %v1291_v41  ;;  %v58_v36 = vmul.f32 %v51_v29, %v1216_v19  ;;  %v59_v6 = vmul.f32 %v51_v29, %v1253_v32  ;;  %v60_v14 = vmul.f32 %v51_v29, %v1273_v37 }
  0x19   :  { %1074 = vmatprep.subr.mxu0 %v44_v48  ;;  %1081 = vmatprep.subr.mxu1 %v46_v49  ;;  %v61_v13 = vmul.f32 %v51_v29, %v1303_v45  ;;  %v62_v15 = vmul.f32 %v51_v29, %v1278_v38  ;;  %v63_v18 = vmul.f32 %v51_v29, %v1308_v46  ;;  %p1100_p4 = pnand %p1099_p3, %p1093_p0 }
  0x1a   :  { %v64_v31 = vmul.f32 %v51_v29, %v1327_v53  ;;  %v65_v19 = vmul.f32 %v51_v29, %v1351_v61  ;;  %v66_v32 = vmul.f32 %v51_v29, %v1333_v54  ;;  %952 = vst [vmem:[#allocation2 + $0x8] sm:$0xff] %v1114_v39  ;;  %951 = vst [vmem:[#allocation2] sm:$0xff] %v1114_v39 }
  0x1b   :  { %1065 = vmatmul.mubr.f32.vlgmr.msra.gmra.mxu0 %v174_v50  ;;  %1072 = vmatmul.mubr.f32.vlgmr.msra.gmra.mxu1 %v176_v51  ;;  %953 = vst [vmem:[#allocation2 + $0x10] sm:$0xff] %v1114_v39  ;;  %954 = vst [vmem:[#allocation2 + $0x18] sm:$0xff] %v1114_v39  ;;  %v67_v37 = vmul.f32 %v51_v29, %v1356_v62 }
  0x1c   :  { %1075 = vmatpush3.xpose.msra.mxu0 %v44_v48  ;;  %1082 = vmatpush3.xpose.msra.mxu1 %v46_v49  ;;  %955 = vst [vmem:[#allocation2 + $0x20] sm:$0xff] %v1114_v39  ;;  %956 = vst [vmem:[#allocation2 + $0x28] sm:$0xff] %v1114_v39 }
  0x1d   :  { %1076 = vmatprep.subr.mxu0 %v43_v56  ;;  %1083 = vmatprep.subr.mxu1 %v45_v57  ;;  %957 = vst [vmem:[#allocation2 + $0x30] sm:$0xff] %v1114_v39  ;;  %958 = vst [vmem:[#allocation2 + $0x38] sm:$0xff] %v1114_v39 }
  0x1e   :  { %124 = vadd.xlane.f32.xlu0 %v123_v59  ;;  %1078 = vmatprep.mubr.f32.mxu0 %v177_v58  ;;  %959 = vst [vmem:[#allocation2 + $0x40] sm:$0xff] %v1114_v39  ;;  %960 = vst [vmem:[#allocation2 + $0x48] sm:$0xff] %v1114_v39 }
  0x1f   :  { %1085 = vmatprep.mubr.f32.mxu1 %v179_v60  ;;  %134 = vadd.xlane.f32.xlu1 %v133_v63  ;;  %961 = vst [vmem:[#allocation2 + $0x50] sm:$0xff] %v1114_v39  ;;  %962 = vst [vmem:[#allocation2 + $0x58] sm:$0xff] %v1114_v39 }
  0x20   :  { %1077 = vmatpush3.xpose.msra.mxu0 %v43_v56  ;;  %1084 = vmatpush3.xpose.msra.mxu1 %v45_v57  ;;  %963 = vst [vmem:[#allocation2 + $0x60] sm:$0xff] %v1114_v39  ;;  %964 = vst [vmem:[#allocation2 + $0x68] sm:$0xff] %v1114_v39 }
  0x21   :  { %965 = vst [vmem:[#allocation2 + $0x70] sm:$0xff] %v1114_v39  ;;  %966 = vst [vmem:[#allocation2 + $0x78] sm:$0xff] %v1114_v39 }
  0x22   :  { %136 = vadd.xlane.f32.xlu0 %v110_v1 }
  0x23   :  { %1079 = vmatmul.mubr.f32.vlgmr.msra.gmra.mxu0 %v178_v2  ;;  %1086 = vmatmul.mubr.f32.vlgmr.msra.gmra.mxu1 %v180_v3 }
  0x24   :  { %139 = vadd.xlane.f32.xlu1 %v138_v4 }
  0x26   :  { %141 = vadd.xlane.f32.xlu0 %v112_v11 }
  0x28   :  { %144 = vadd.xlane.f32.xlu1 %v143_v17 }
  0x2a   :  { %146 = vadd.xlane.f32.xlu0 %v114_v22 }
  0x2c   :  { %149 = vadd.xlane.f32.xlu1 %v148_v8 }
  0x2e   :  { %151 = vadd.xlane.f32.xlu0 %v116_v24 }
  0x30   :  { %154 = vadd.xlane.f32.xlu1 %v153_v26 }
  0x32   :  { %156 = vadd.xlane.f32.xlu0 %v118_v28 }
  0x34   :  { %159 = vadd.xlane.f32.xlu1 %v158_v30 }
  0x36   :  { %68 = vadd.xlane.f32.xlu0 %v52_v33 }
  0x38   :  { %70 = vadd.xlane.f32.xlu1 %v53_v34 }
  0x3a   :  { %72 = vadd.xlane.f32.xlu0 %v54_v5 }
  0x3c   :  { %74 = vadd.xlane.f32.xlu1 %v55_v35 }
  0x3e   :  { %76 = vadd.xlane.f32.xlu0 %v56_v20 }
  0x40   :  { %78 = vadd.xlane.f32.xlu1 %v57_v7 }
  0x42   :  { %80 = vadd.xlane.f32.xlu0 %v58_v36 }
  0x44   :  { %82 = vadd.xlane.f32.xlu1 %v59_v6 }
  0x46   :  { %84 = vadd.xlane.f32.xlu0 %v60_v14 }
  0x48   :  { %86 = vadd.xlane.f32.xlu1 %v61_v13 }
  0x4a   :  { %88 = vadd.xlane.f32.xlu0 %v62_v15 }
  0x4c   :  { %90 = vadd.xlane.f32.xlu1 %v63_v18 }
  0x4e   :  { %92 = vadd.xlane.f32.xlu0 %v64_v31 }
  0x50   :  { %94 = vadd.xlane.f32.xlu1 %v65_v19 }
  0x52   :  { %96 = vadd.xlane.f32.xlu0 %v66_v32 }
  0x54   :  { %98 = vadd.xlane.f32.xlu1 %v67_v37 }
  0x98   :  { %v127_v38 = vpop.xlane.xlu1 %126  ;;  %v121_v40 = vpop.xlane.xlu0 %120 }
  0x99   :  { %v813_v41 = vrot.slane %v127_v38, %v1201_v16  ;;  %v802_v46 = vrot.slane %v121_v40, %v1201_v16 }
  0xa0   :  { %v130_v42 = vpop.xlane.xlu1 %129  ;;  %v132_v43 = vpop.xlane.xlu0 %131 }
  0xa1   :  { %v817_v44 = vrot.slane %v130_v42, %v1373_v12  ;;  %v822_v47 = vrot.slane %v132_v43, %v1201_v16 }
  0xa3   :  { %v818_v45 = vsel %vm808_vm1, %v817_v44, %v813_v41 }
  0xa7   :  { %v125_v48 = vpop.xlane.xlu0 %124 }
  0xa8   :  { %v807_v49 = vrot.slane %v125_v48, %v1373_v12  ;;  %v135_v50 = vpop.xlane.xlu1 %134 }
  0xa9   :  { %v826_v51 = vrot.slane %v135_v50, %v1373_v12 }
  0xaa   :  { %v809_v52 = vsel %vm808_vm1, %v807_v49, %v802_v46 }
  0xab   :  { %v137_v53 = vpop.xlane.xlu0 %136  ;;  %v1414_v54 = vsel %vm808_vm1, %v826_v51, %v822_v47 }
  0xac   :  { %v831_v55 = vrot.slane %v137_v53, %v1201_v16 }
  0xad   :  { %v140_v56 = vpop.xlane.xlu1 %139 }
  0xae   :  { %v835_v57 = vrot.slane %v140_v56, %v1373_v12 }
  0xaf   :  { %v142_v58 = vpop.xlane.xlu0 %141 }
  0xb0   :  { %v840_v59 = vrot.slane %v142_v58, %v1201_v16  ;;  %v836_v60 = vsel %vm808_vm1, %v835_v57, %v831_v55 }
  0xb1   :  { %v145_v61 = vpop.xlane.xlu1 %144 }
  0xb2   :  { %v844_v62 = vrot.slane %v145_v61, %v1373_v12 }
  0xb3   :  { %v147_v63 = vpop.xlane.xlu0 %146 }
  0xb4   :  { %v849_v0 = vrot.slane %v147_v63, %v1201_v16  ;;  %v1423_v1 = vsel %vm808_vm1, %v844_v62, %v840_v59 }
  0xb5   :  { %v150_v2 = vpop.xlane.xlu1 %149 }
  0xb6   :  { %v853_v3 = vrot.slane %v150_v2, %v1373_v12 }
  0xb7   :  { %v152_v4 = vpop.xlane.xlu0 %151 }
  0xb8   :  { %v858_v9 = vrot.slane %v152_v4, %v1201_v16  ;;  %v1428_v10 = vsel %vm808_vm1, %v853_v3, %v849_v0 }
  0xb9   :  { %v155_v11 = vpop.xlane.xlu1 %154 }
  0xba   :  { %v862_v17 = vrot.slane %v155_v11, %v1373_v12 }
  0xbb   :  { %v157_v21 = vpop.xlane.xlu0 %156 }
  0xbc   :  { %v867_v22 = vrot.slane %v157_v21, %v1201_v16  ;;  %v1433_v8 = vsel %vm808_vm1, %v862_v17, %v858_v9 }
  0xbd   :  { %v160_v23 = vpop.xlane.xlu1 %159 }
  0xbe   :  { %v871_v24 = vrot.slane %v160_v23, %v1373_v12 }
  0xbf   :  { %v69_v25 = vpop.xlane.xlu0 %68 }
  0xc0   :  { %v1437_v26 = vsel %vm808_vm1, %v871_v24, %v867_v22 }
  0xc1   :  { %v71_v27 = vpop.xlane.xlu1 %70 }
  0xc3   :  { %v73_v28 = vpop.xlane.xlu0 %72 }
  0xc5   :  { %v75_v29 = vpop.xlane.xlu1 %74 }
  0xc7   :  { %v77_v30 = vpop.xlane.xlu0 %76 }
  0xc9   :  { %v79_v33 = vpop.xlane.xlu1 %78 }
  0xcb   :  { %v1038_v34 = vpop.f32.mrf.mxu0  ;;  %v1045_v5 = vpop.f32.mrf.mxu1 }
  0xcc   :  { %v253_v35 = vadd.f32 %v1038_v34, %v71_v27  ;;  %v328_v20 = vadd.f32 %v1045_v5, %v75_v29  ;;  %v81_v16 = vpop.xlane.xlu0 %80 }
  0xcd   :  { %v247_v7 = vpop.f32.mrf.mxu0  ;;  %v322_v36 = vpop.f32.mrf.mxu1 }
  0xce   :  { %v936_v6 = vadd.f32 %v809_v52, %v253_v35  ;;  %v938_v14 = vadd.f32 %v818_v45, %v328_v20  ;;  %v248_v12 = vadd.f32 %v247_v7, %v69_v25  ;;  %v323_v13 = vadd.f32 %v322_v36, %v73_v28  ;;  %v83_v15 = vpop.xlane.xlu1 %82 }
  0xd0   :  { %969 = vst.msk [vmem:[#allocation2 + $0x8] sm:$0xff] %vm967_vm2, %v936_v6  ;;  %971 = vst.msk [vmem:[#allocation2 + $0x18] sm:$0xff] %vm967_vm2, %v938_v14  ;;  %v935_v18 = vadd.f32 %v809_v52, %v248_v12  ;;  %v937_v31 = vadd.f32 %v818_v45, %v323_v13  ;;  %v85_v19 = vpop.xlane.xlu0 %84 }
  0xd2   :  { %968 = vst.msk [vmem:[#allocation2] sm:$0xff] %vm967_vm2, %v935_v18  ;;  %970 = vst.msk [vmem:[#allocation2 + $0x10] sm:$0xff] %vm967_vm2, %v937_v31  ;;  %v87_v32 = vpop.xlane.xlu1 %86 }
  0xd3   :  { %v1059_v39 = vpop.f32.mrf.mxu1  ;;  %v1052_v37 = vpop.f32.mrf.mxu0 }
  0xd4   :  { %v478_v38 = vadd.f32 %v1059_v39, %v83_v15  ;;  %v403_v40 = vadd.f32 %v1052_v37, %v79_v33  ;;  %v89_v49 = vpop.xlane.xlu0 %88 }
  0xd5   :  { %v397_v41 = vpop.f32.mrf.mxu0  ;;  %v472_v42 = vpop.f32.mrf.mxu1 }
  0xd6   :  { %v942_v43 = vadd.f32 %v836_v60, %v478_v38  ;;  %v940_v44 = vadd.f32 %v1414_v54, %v403_v40  ;;  %v398_v46 = vadd.f32 %v397_v41, %v77_v30  ;;  %v473_v47 = vadd.f32 %v472_v42, %v81_v16  ;;  %v91_v48 = vpop.xlane.xlu1 %90 }
  0xd8   :  { %975 = vst.msk [vmem:[#allocation2 + $0x38] sm:$0xff] %vm967_vm2, %v942_v43  ;;  %973 = vst.msk [vmem:[#allocation2 + $0x28] sm:$0xff] %vm967_vm2, %v940_v44  ;;  %v939_v45 = vadd.f32 %v1414_v54, %v398_v46  ;;  %v941_v50 = vadd.f32 %v836_v60, %v473_v47  ;;  %v93_v57 = vpop.xlane.xlu0 %92 }
  0xda   :  { %972 = vst.msk [vmem:[#allocation2 + $0x20] sm:$0xff] %vm967_vm2, %v939_v45  ;;  %974 = vst.msk [vmem:[#allocation2 + $0x30] sm:$0xff] %vm967_vm2, %v941_v50  ;;  %v95_v51 = vpop.xlane.xlu1 %94 }
  0xdb   :  { %v1073_v52 = vpop.f32.mrf.mxu1  ;;  %v1066_v53 = vpop.f32.mrf.mxu0 }
  0xdc   :  { %v628_v55 = vadd.f32 %v1073_v52, %v91_v48  ;;  %v553_v56 = vadd.f32 %v1066_v53, %v87_v32  ;;  %v97_v3 = vpop.xlane.xlu0 %96 }
  0xdd   :  { %v547_v58 = vpop.f32.mrf.mxu0  ;;  %v622_v59 = vpop.f32.mrf.mxu1 }
  0xde   :  { %v946_v61 = vadd.f32 %v1428_v10, %v628_v55  ;;  %v944_v62 = vadd.f32 %v1423_v1, %v553_v56  ;;  %v548_v63 = vadd.f32 %v547_v58, %v85_v19  ;;  %v623_v0 = vadd.f32 %v622_v59, %v89_v49  ;;  %v99_v2 = vpop.xlane.xlu1 %98 }
  0xe0   :  { %979 = vst.msk [vmem:[#allocation2 + $0x58] sm:$0xff] %vm967_vm2, %v946_v61  ;;  %977 = vst.msk [vmem:[#allocation2 + $0x48] sm:$0xff] %vm967_vm2, %v944_v62  ;;  %v943_v54 = vadd.f32 %v1423_v1, %v548_v63  ;;  %v945_v60 = vadd.f32 %v1428_v10, %v623_v0 }
  0xe2   :  { %976 = vst.msk [vmem:[#allocation2 + $0x40] sm:$0xff] %vm967_vm2, %v943_v54  ;;  %978 = vst.msk [vmem:[#allocation2 + $0x50] sm:$0xff] %vm967_vm2, %v945_v60 }
  0xe3   :  { %v1087_v4 = vpop.f32.mrf.mxu1  ;;  %v1080_v9 = vpop.f32.mrf.mxu0 }
  0xe4   :  { %v778_v11 = vadd.f32 %v1087_v4, %v99_v2  ;;  %v703_v17 = vadd.f32 %v1080_v9, %v95_v51 }
  0xe5   :  { %v697_v21 = vpop.f32.mrf.mxu0  ;;  %v772_v22 = vpop.f32.mrf.mxu1 }
  0xe6   :  { %v950_v23 = vadd.f32 %v1437_v26, %v778_v11  ;;  %v948_v1 = vadd.f32 %v1433_v8, %v703_v17  ;;  %v698_v24 = vadd.f32 %v697_v21, %v93_v57  ;;  %v773_v10 = vadd.f32 %v772_v22, %v97_v3 }
  0xe8   :  { %983 = vst.msk [vmem:[#allocation2 + $0x78] sm:$0xff] %vm967_vm2, %v950_v23  ;;  %981 = vst.msk [vmem:[#allocation2 + $0x68] sm:$0xff] %vm967_vm2, %v948_v1  ;;  %v947_v25 = vadd.f32 %v1433_v8, %v698_v24  ;;  %v949_v27 = vadd.f32 %v1437_v26, %v773_v10 }
  0xea   :  { %980 = vst.msk [vmem:[#allocation2 + $0x60] sm:$0xff] %vm967_vm2, %v947_v25  ;;  %982 = vst.msk [vmem:[#allocation2 + $0x70] sm:$0xff] %vm967_vm2, %v949_v27 }
  0xeb   :  { %1103 = shalt.err (!%p1100_p4)
}
  0xec   :  { %s1116_s23 = smov 128   ;;  %s1117_s24 = smov 8  }
  0xed   :  { %995 = dma.vmem_to_hbm [thread:$0]  %s990_s1, 2048, %s1471_s3, [#allocation3], %s1116_s23, %s1116_s23, %s1117_s24  }
  0xee   :  { %1112 = dma.done.wait [#allocation3], 2048  }
  0xef   :  { %1113 = vsyncadd [#allocation3], 4294965248 }
  0xf0   :  { %999 = vsyncpa [#allocation3], 1 }

</bundles_post_ra>
